<compile_context>
chip_gen: v7x
topology: tpu7x:2x2x1
jax: 0.10.0
libtpu: 0.0.40
codegen_flags: <defaults>
</compile_context>

<pallas_src>
import jax
import jax.numpy as jnp
from jax.experimental import pallas as pl
from jax.experimental.pallas import tpu as pltpu


def _fnn_kernel(x_ref, w1_ref, b1_ref, w2_ref, b2_ref, w3_ref, b3_ref,
                w4_ref, b4_ref, o_ref):
    # x_ref : (TM, D)      f32   (cast to bf16 in-kernel)
    # wk_ref: (in, out)    bf16  bk_ref: (1, out) f32
    # o_ref : (TM, Cp)     f32   (Cp = 128-padded output width)
    h = x_ref[...].astype(jnp.bfloat16)                       # VPU cast, no extra HBM pass
    h = jnp.dot(h, w1_ref[...], preferred_element_type=jnp.float32) + b1_ref[...]
    h = jnp.maximum(h, 0.0).astype(jnp.bfloat16)              # F.relu(fc1(x))
    h = jnp.dot(h, w2_ref[...], preferred_element_type=jnp.float32) + b2_ref[...]
    h = jnp.maximum(h, 0.0).astype(jnp.bfloat16)              # F.relu(fc2(x))
    h = jnp.dot(h, w3_ref[...], preferred_element_type=jnp.float32) + b3_ref[...]
    h = jnp.maximum(h, 0.0).astype(jnp.bfloat16)              # F.relu(fc3(x))
    o_ref[...] = jnp.dot(h, w4_ref[...],
                         preferred_element_type=jnp.float32) + b4_ref[...]  # fc4


def _round_up(n, m):
    return ((n + m - 1) // m) * m


def _pick_tm(B, tile_m):
    """Batch tile: big enough to amortize per-step overhead, >=2 steps for 2-TC chips."""
    if B <= 8:
        return B                         # single tiny (full-extent) block
    if B <= 2 * tile_m:
        # split into two steps so both v7x TensorCores get work; keep a multiple of 8
        return min(tile_m, _round_up(pl.cdiv(B, 2), 8))
    return tile_m


def fnn_forward(x, prepped_params, out_dim, tile_m=1024):
    """x: (B, D) f32  ->  (B, out_dim) f32"""
    w1, b1, w2, b2, w3, b3, w4, b4 = prepped_params
    B, D = x.shape
    Hp = w1.shape[1]                     # padded hidden width (256)
    Cp = w4.shape[1]                     # padded output width (128)

    tm = _pick_tm(B, tile_m)
    grid = (pl.cdiv(B, tm),)             # partial tail block OK: rows are independent,
                                         # OOB output rows are masked on writeback.

    x_spec = pl.BlockSpec((tm, D), lambda i: (i, 0))
    o_spec = pl.BlockSpec((tm, Cp), lambda i: (i, 0))
    # Full-array, grid-invariant blocks: DMA'd once, resident in VMEM across all steps.
    res = lambda a: pl.BlockSpec(a.shape, lambda i: (0, 0))

    flops = 2 * B * (D * Hp + 2 * Hp * Hp + Hp * Cp)
    weight_bytes = sum(int(a.size) * a.dtype.itemsize for a in prepped_params)
    bytes_accessed = int(x.size) * x.dtype.itemsize + weight_bytes + B * Cp * 4

    y_pad = pl.pallas_call(
        _fnn_kernel,
        out_shape=jax.ShapeDtypeStruct((B, Cp), jnp.float32),
        grid=grid,
        in_specs=[x_spec,
                  res(w1), res(b1), res(w2), res(b2),
                  res(w3), res(b3), res(w4), res(b4)],
        out_specs=o_spec,
        compiler_params=pltpu.CompilerParams(
            dimension_semantics=("parallel",)),
        cost_estimate=pl.CostEstimate(flops=flops, transcendentals=0,
                                      bytes_accessed=bytes_accessed),
    )(x, w1, b1, w2, b2, w3, b3, w4, b4)

    # Slice away the lane-padding on the output width.
    return y_pad[:, :out_dim]


def init_params(key, data_vec_len, cent_vec_len, hidden=250):
    """f32 params mimicking nn.Linear default init (uniform +-1/sqrt(fan_in)),
    stored pre-transposed as (fan_in, fan_out)."""
    def linear(k, fan_in, fan_out):
        kw, kb = jax.random.split(k)
        bound = 1.0 / jnp.sqrt(jnp.float32(fan_in))
        w_t = jax.random.uniform(kw, (fan_in, fan_out), jnp.float32, -bound, bound)
        b = jax.random.uniform(kb, (1, fan_out), jnp.float32, -bound, bound)
        return w_t, b

    k1, k2, k3, k4 = jax.random.split(key, 4)
    w1, b1 = linear(k1, data_vec_len, hidden)      # fc1
    w2, b2 = linear(k2, hidden, hidden)            # fc2
    w3, b3 = linear(k3, hidden, hidden)            # fc3
    w4, b4 = linear(k4, hidden, cent_vec_len)      # fc4
    return (w1, b1, w2, b2, w3, b3, w4, b4)


def prepare_params(params, lane=128):
    """Zero-pad hidden (250->256) and output (28->128) widths to lane multiples and
    cast weights to bf16 (biases stay f32)."""
    w1, b1, w2, b2, w3, b3, w4, b4 = params
    H = w1.shape[1]
    C = w4.shape[1]
    ph = _round_up(H, lane) - H
    pc = _round_up(C, lane) - C

    pad_cols = lambda a, p: jnp.pad(a, ((0, 0), (0, p)))
    pad_rows = lambda a, p: jnp.pad(a, ((0, p), (0, 0)))

    bf = jnp.bfloat16
    return (pad_cols(w1, ph).astype(bf),               pad_cols(b1, ph),
            pad_cols(pad_rows(w2, ph), ph).astype(bf), pad_cols(b2, ph),
            pad_cols(pad_rows(w3, ph), ph).astype(bf), pad_cols(b3, ph),
            pad_cols(pad_rows(w4, ph), pc).astype(bf), pad_cols(b4, pc))


def reference_forward_f32(x, params):
    w1, b1, w2, b2, w3, b3, w4, b4 = params
    h = jax.nn.relu(x @ w1 + b1)
    h = jax.nn.relu(h @ w2 + b2)
    h = jax.nn.relu(h @ w3 + b3)
    return h @ w4 + b4


def reference_forward_bf16(x, prepped, out_dim):
    """Pure-JAX reference doing the same bf16 quantization / padding as the kernel."""
    w1, b1, w2, b2, w3, b3, w4, b4 = prepped
    h = x.astype(jnp.bfloat16)
    h = jax.nn.relu(jnp.dot(h, w1, preferred_element_type=jnp.float32) + b1).astype(jnp.bfloat16)
    h = jax.nn.relu(jnp.dot(h, w2, preferred_element_type=jnp.float32) + b2).astype(jnp.bfloat16)
    h = jax.nn.relu(jnp.dot(h, w3, preferred_element_type=jnp.float32) + b3).astype(jnp.bfloat16)
    y = jnp.dot(h, w4, preferred_element_type=jnp.float32) + b4
    return y[:, :out_dim]


if __name__ == "__main__":
    # Shapes consistent with the module:
    #   Data_Vector_Length = 100, hidden = 250, args.centord_Vector_Length = 28
    B = 8
    DATA_VEC_LEN = 100
    CENT_VEC_LEN = 28
    HIDDEN = 250

    key = jax.random.PRNGKey(0)
    k_params, k_x, k_x2 = jax.random.split(key, 3)

    params = init_params(k_params, DATA_VEC_LEN, CENT_VEC_LEN, HIDDEN)
    prepped = prepare_params(params)

    # Small-batch check (single grid step).
    x = jax.random.normal(k_x, (B, DATA_VEC_LEN), jnp.float32)
    y = jax.block_until_ready(fnn_forward(x, prepped, CENT_VEC_LEN))
    assert y.shape == (B, CENT_VEC_LEN)

    y_bf16_ref = jax.block_until_ready(reference_forward_bf16(x, prepped, CENT_VEC_LEN))
    y_f32_ref = jax.block_until_ready(reference_forward_f32(x, params))
    assert jnp.allclose(y, y_bf16_ref, atol=2e-2, rtol=2e-2), "mismatch vs bf16 JAX reference"
    assert jnp.allclose(y, y_f32_ref, atol=1e-1, rtol=1e-1), "mismatch vs f32 JAX reference"

    # Multi-step grid check with a partial tail block (B2=50 -> tm=32, grid=(2,)).
    B2 = 50
    x2 = jax.random.normal(k_x2, (B2, DATA_VEC_LEN), jnp.float32)
    y2 = jax.block_until_ready(fnn_forward(x2, prepped, CENT_VEC_LEN))
    y2_bf16_ref = jax.block_until_ready(reference_forward_bf16(x2, prepped, CENT_VEC_LEN))
    assert y2.shape == (B2, CENT_VEC_LEN)
    assert jnp.allclose(y2, y2_bf16_ref, atol=2e-2, rtol=2e-2), "tiled-grid mismatch vs bf16 ref"

    print("KERNEL_OK")
</pallas_src>

<mosaic_0001>
module attributes {stable_mosaic.version = 11 : i64} {
  func.func @_fnn_kernel(%arg0: i32, %arg1: memref<8x100xf32, #tpu.memory_space<vmem>>, %arg2: memref<100x256xbf16, #tpu.memory_space<vmem>>, %arg3: memref<1x256xf32, #tpu.memory_space<vmem>>, %arg4: memref<256x256xbf16, #tpu.memory_space<vmem>>, %arg5: memref<1x256xf32, #tpu.memory_space<vmem>>, %arg6: memref<256x256xbf16, #tpu.memory_space<vmem>>, %arg7: memref<1x256xf32, #tpu.memory_space<vmem>>, %arg8: memref<256x128xbf16, #tpu.memory_space<vmem>>, %arg9: memref<1x128xf32, #tpu.memory_space<vmem>>, %arg10: memref<8x128xf32, #tpu.memory_space<vmem>>) attributes {dimension_semantics = [#tpu.dimension_semantics<parallel>], iteration_bounds = array<i64: 1>, scalar_prefetch = 0 : i64, scratch_operands = 0 : i64, tpu.core_type = #tpu.core_type<tc>, window_params = [{transform_indices = @transform_0, window_bounds = array<i64: 8, 100>}, {pipeline_mode = #tpu.pipeline_mode<synchronous>, transform_indices = @transform_1, window_bounds = array<i64: 100, 256>}, {pipeline_mode = #tpu.pipeline_mode<synchronous>, transform_indices = @transform_2, window_bounds = array<i64: 1, 256>}, {pipeline_mode = #tpu.pipeline_mode<synchronous>, transform_indices = @transform_3, window_bounds = array<i64: 256, 256>}, {pipeline_mode = #tpu.pipeline_mode<synchronous>, transform_indices = @transform_4, window_bounds = array<i64: 1, 256>}, {pipeline_mode = #tpu.pipeline_mode<synchronous>, transform_indices = @transform_5, window_bounds = array<i64: 256, 256>}, {pipeline_mode = #tpu.pipeline_mode<synchronous>, transform_indices = @transform_6, window_bounds = array<i64: 1, 256>}, {pipeline_mode = #tpu.pipeline_mode<synchronous>, transform_indices = @transform_7, window_bounds = array<i64: 256, 128>}, {pipeline_mode = #tpu.pipeline_mode<synchronous>, transform_indices = @transform_8, window_bounds = array<i64: 1, 128>}, {transform_indices = @transform_9, window_bounds = array<i64: 8, 128>}]} {
    %c0 = arith.constant 0 : index
    %c0_0 = arith.constant 0 : index
    %0 = vector.load %arg1[%c0, %c0_0] : memref<8x100xf32, #tpu.memory_space<vmem>>, vector<8x100xf32>
    %1 = arith.truncf %0 : vector<8x100xf32> to vector<8x100xbf16>
    %c0_1 = arith.constant 0 : index
    %c0_2 = arith.constant 0 : index
    %2 = vector.load %arg2[%c0_1, %c0_2] : memref<100x256xbf16, #tpu.memory_space<vmem>>, vector<100x256xbf16>
    %cst = arith.constant dense<0.000000e+00> : vector<8x256xf32>
    %3 = tpu.matmul %1, %2, %cst {dimension_numbers = #tpu.dot_dimension_numbers<[1], [0], [0], [1], [0, 0, 1, 1], [], []>} : vector<8x100xbf16>, vector<100x256xbf16>, vector<8x256xf32> -> vector<8x256xf32>
    %c0_3 = arith.constant 0 : index
    %c0_4 = arith.constant 0 : index
    %4 = vector.load %arg3[%c0_3, %c0_4] : memref<1x256xf32, #tpu.memory_space<vmem>>, vector<1x256xf32>
    %5 = vector.broadcast %4 : vector<1x256xf32> to vector<8x256xf32>
    %6 = arith.addf %3, %5 : vector<8x256xf32>
    %cst_5 = arith.constant 0.000000e+00 : f32
    %7 = vector.broadcast %cst_5 : f32 to vector<8x256xf32>
    %8 = arith.maximumf %6, %7 : vector<8x256xf32>
    %9 = arith.truncf %8 : vector<8x256xf32> to vector<8x256xbf16>
    %c0_6 = arith.constant 0 : index
    %c0_7 = arith.constant 0 : index
    %10 = vector.load %arg4[%c0_6, %c0_7] : memref<256x256xbf16, #tpu.memory_space<vmem>>, vector<256x256xbf16>
    %cst_8 = arith.constant dense<0.000000e+00> : vector<8x256xf32>
    %11 = tpu.matmul %9, %10, %cst_8 {dimension_numbers = #tpu.dot_dimension_numbers<[1], [0], [0], [1], [0, 0, 1, 1], [], []>} : vector<8x256xbf16>, vector<256x256xbf16>, vector<8x256xf32> -> vector<8x256xf32>
    %c0_9 = arith.constant 0 : index
    %c0_10 = arith.constant 0 : index
    %12 = vector.load %arg5[%c0_9, %c0_10] : memref<1x256xf32, #tpu.memory_space<vmem>>, vector<1x256xf32>
    %13 = vector.broadcast %12 : vector<1x256xf32> to vector<8x256xf32>
    %14 = arith.addf %11, %13 : vector<8x256xf32>
    %cst_11 = arith.constant 0.000000e+00 : f32
    %15 = vector.broadcast %cst_11 : f32 to vector<8x256xf32>
    %16 = arith.maximumf %14, %15 : vector<8x256xf32>
    %17 = arith.truncf %16 : vector<8x256xf32> to vector<8x256xbf16>
    %c0_12 = arith.constant 0 : index
    %c0_13 = arith.constant 0 : index
    %18 = vector.load %arg6[%c0_12, %c0_13] : memref<256x256xbf16, #tpu.memory_space<vmem>>, vector<256x256xbf16>
    %cst_14 = arith.constant dense<0.000000e+00> : vector<8x256xf32>
    %19 = tpu.matmul %17, %18, %cst_14 {dimension_numbers = #tpu.dot_dimension_numbers<[1], [0], [0], [1], [0, 0, 1, 1], [], []>} : vector<8x256xbf16>, vector<256x256xbf16>, vector<8x256xf32> -> vector<8x256xf32>
    %c0_15 = arith.constant 0 : index
    %c0_16 = arith.constant 0 : index
    %20 = vector.load %arg7[%c0_15, %c0_16] : memref<1x256xf32, #tpu.memory_space<vmem>>, vector<1x256xf32>
    %21 = vector.broadcast %20 : vector<1x256xf32> to vector<8x256xf32>
    %22 = arith.addf %19, %21 : vector<8x256xf32>
    %cst_17 = arith.constant 0.000000e+00 : f32
    %23 = vector.broadcast %cst_17 : f32 to vector<8x256xf32>
    %24 = arith.maximumf %22, %23 : vector<8x256xf32>
    %25 = arith.truncf %24 : vector<8x256xf32> to vector<8x256xbf16>
    %c0_18 = arith.constant 0 : index
    %c0_19 = arith.constant 0 : index
    %26 = vector.load %arg8[%c0_18, %c0_19] : memref<256x128xbf16, #tpu.memory_space<vmem>>, vector<256x128xbf16>
    %cst_20 = arith.constant dense<0.000000e+00> : vector<8x128xf32>
    %27 = tpu.matmul %25, %26, %cst_20 {dimension_numbers = #tpu.dot_dimension_numbers<[1], [0], [0], [1], [0, 0, 1, 1], [], []>} : vector<8x256xbf16>, vector<256x128xbf16>, vector<8x128xf32> -> vector<8x128xf32>
    %c0_21 = arith.constant 0 : index
    %c0_22 = arith.constant 0 : index
    %28 = vector.load %arg9[%c0_21, %c0_22] : memref<1x128xf32, #tpu.memory_space<vmem>>, vector<1x128xf32>
    %29 = vector.broadcast %28 : vector<1x128xf32> to vector<8x128xf32>
    %30 = arith.addf %27, %29 : vector<8x128xf32>
    %c0_23 = arith.constant 0 : index
    %c0_24 = arith.constant 0 : index
    %31 = vector.load %arg10[%c0_23, %c0_24] : memref<8x128xf32, #tpu.memory_space<vmem>>, vector<8x128xf32>
    tpu.vector_store %arg10[%c0_23, %c0_24], %30 {strides = array<i32>} : memref<8x128xf32, #tpu.memory_space<vmem>>, vector<8x128xf32>,
    return
  }
  func.func @transform_0(%arg0: i32) -> (i32, i32) {
    %c0_i32 = arith.constant 0 : i32
    %c0_i32_0 = arith.constant 0 : i32
    return %arg0, %c0_i32 : i32, i32
  }
  func.func @transform_1(%arg0: i32) -> (i32, i32) {
    %c0_i32 = arith.constant 0 : i32
    %c0_i32_0 = arith.constant 0 : i32
    %c0_i32_1 = arith.constant 0 : i32
    return %c0_i32, %c0_i32_0 : i32, i32
  }
  func.func @transform_2(%arg0: i32) -> (i32, i32) {
    %c0_i32 = arith.constant 0 : i32
    %c0_i32_0 = arith.constant 0 : i32
    %c0_i32_1 = arith.constant 0 : i32
    return %c0_i32, %c0_i32_0 : i32, i32
  }
  func.func @transform_3(%arg0: i32) -> (i32, i32) {
    %c0_i32 = arith.constant 0 : i32
    %c0_i32_0 = arith.constant 0 : i32
    %c0_i32_1 = arith.constant 0 : i32
    return %c0_i32, %c0_i32_0 : i32, i32
  }
  func.func @transform_4(%arg0: i32) -> (i32, i32) {
    %c0_i32 = arith.constant 0 : i32
    %c0_i32_0 = arith.constant 0 : i32
    %c0_i32_1 = arith.constant 0 : i32
    return %c0_i32, %c0_i32_0 : i32, i32
  }
  func.func @transform_5(%arg0: i32) -> (i32, i32) {
    %c0_i32 = arith.constant 0 : i32
    %c0_i32_0 = arith.constant 0 : i32
    %c0_i32_1 = arith.constant 0 : i32
    return %c0_i32, %c0_i32_0 : i32, i32
  }
  func.func @transform_6(%arg0: i32) -> (i32, i32) {
    %c0_i32 = arith.constant 0 : i32
    %c0_i32_0 = arith.constant 0 : i32
    %c0_i32_1 = arith.constant 0 : i32
    return %c0_i32, %c0_i32_0 : i32, i32
  }
  func.func @transform_7(%arg0: i32) -> (i32, i32) {
    %c0_i32 = arith.constant 0 : i32
    %c0_i32_0 = arith.constant 0 : i32
    %c0_i32_1 = arith.constant 0 : i32
    return %c0_i32, %c0_i32_0 : i32, i32
  }
  func.func @transform_8(%arg0: i32) -> (i32, i32) {
    %c0_i32 = arith.constant 0 : i32
    %c0_i32_0 = arith.constant 0 : i32
    %c0_i32_1 = arith.constant 0 : i32
    return %c0_i32, %c0_i32_0 : i32, i32
  }
  func.func @transform_9(%arg0: i32) -> (i32, i32) {
    %c0_i32 = arith.constant 0 : i32
    %c0_i32_0 = arith.constant 0 : i32
    return %arg0, %c0_i32 : i32, i32
  }
}

</mosaic_0001>

<bundles_post_ra>
// kernel: tpu_custom_call.1
= control target key start
LH: loop header
LB: loop body
LE: loop exit
PB: predicated region body
PF: predicated region fallthrough
CT: control target
= control target key end

     0   :  { %14 = vsyncpa [#allocation3], 0  ;;  %s1505_s0 = inlined_call_operand.hbm [shape: f32[8,100], index: 0, kind: input, shape index: {}]   ;;  %s1506_s1 = inlined_call_operand.hbm [shape: bf16[100,256], index: 1, kind: input, shape index: {}]   ;;  %s1507_s2 = inlined_call_operand.vmem [shape: f32[1,256], index: 2, kind: input, shape index: {}]   ;;  %s1508_s3 = inlined_call_operand.hbm [shape: bf16[256,256], index: 3, kind: input, shape index: {}]   ;;  %s1509_s4 = inlined_call_operand.vmem [shape: f32[1,256], index: 4, kind: input, shape index: {}]   ;;  %s1510_s5 = inlined_call_operand.hbm [shape: bf16[256,256], index: 5, kind: input, shape index: {}]   ;;  %s1511_s6 = inlined_call_operand.vmem [shape: f32[1,256], index: 6, kind: input, shape index: {}]   ;;  %s1512_s7 = inlined_call_operand.hbm [shape: bf16[256,128], index: 7, kind: input, shape index: {}]   ;;  %s1513_s8 = inlined_call_operand.vmem [shape: f32[1,128], index: 8, kind: input, shape index: {}]   ;;  %s1514_s9 = inlined_call_operand.hbm [shape: f32[8,128], index: 9, kind: output, shape index: {}]  }
   0x1   :  { %15 = vsyncpa [#allocation6], 0 }
   0x2   :  { %16 = vsyncpa [#allocation9], 0 }
   0x3   :  { %17 = vsyncpa [#allocation4], 0  ;;  %s1341_s30 = smov [#allocation5]   ;;  %s1201_s13 = scalar_lea.hbm %s1506_s1, 1664 }
   0x4   :  { %s33_s10 = sshll.u32 %s1341_s30, 4  ;;  %p1202_p0 = scmp.ne.s32.totalorder %s1506_s1, %s1201_s13  ;;  %s34_s10 = int_to_ptr.vmem [resolvable:$true] %s33_s10 }
   0x5   :  { %p1205_p1 = scmp.lt.u32.totalorder %s1201_s13, %s1506_s1 }
   0x7   :  { %p1207_p2 = pnand %p1205_p1, %p1202_p0 }
   0x9   :  { %1210 = shalt.err (!%p1207_p2)
}
   0xa   :  { %s1211_s18 = scalar_lea.vmem %s34_s10, 1664  ;;  %p1216_p4 = scmp.lt.s32.totalorder %s34_s10, %s34_s10 }
   0xb   :  { %p1212_p3 = scmp.ne.s32.totalorder %s34_s10, %s1211_s18  ;;  %p1217_p5 = scmp.lt.s32.totalorder %s1211_s18, %s1211_s18 }
   0xd   :  { %p1218_p6 = por %p1217_p5, %p1216_p4 }
   0xf   :  { %p1219_p7 = pnand %p1218_p6, %p1212_p3 }
  0x11   :  { %1222 = shalt.err (!%p1219_p7)
}
  0x12   :  { %s1342_s19 = smov 128   ;;  %s1343_s20 = smov 8  }
  0x13   :  { %39 = dma.hbm_to_vmem [thread:$0]  %s1506_s1, 1664, %s34_s10, [#allocation6], %s1342_s19, %s1342_s19, %s1343_s20  }
  0x14   :  { %s1344_s23 = smov [#allocation8]   ;;  %s1345_s25 = smov [#allocation2]  }
  0x15   :  { %s61_s24 = sshll.u32 %s1344_s23, 4  ;;  %s24_s26 = sshll.u32 %s1345_s25, 4  ;;  %s62_s24 = int_to_ptr.vmem [resolvable:$true] %s61_s24  ;;  %s25_s26 = int_to_ptr.vmem [resolvable:$true] %s24_s26 }
  0x16   :  { %s1223_s29 = scalar_lea.hbm %s1510_s5, 4096 }
  0x17   :  { %p1224_p8 = scmp.ne.s32.totalorder %s1510_s5, %s1223_s29  ;;  %p1227_p9 = scmp.lt.u32.totalorder %s1223_s29, %s1510_s5 }
  0x19   :  { %p1229_p10 = pnand %p1227_p9, %p1224_p8 }
  0x1b   :  { %1232 = shalt.err (!%p1229_p10)
}
  0x1c   :  { %s1233_s1 = scalar_lea.vmem %s62_s24, 4096  ;;  %p1238_p12 = scmp.lt.s32.totalorder %s62_s24, %s62_s24 }
  0x1d   :  { %p1234_p11 = scmp.ne.s32.totalorder %s62_s24, %s1233_s1  ;;  %p1239_p13 = scmp.lt.s32.totalorder %s1233_s1, %s1233_s1 }
  0x1f   :  { %p1240_p0 = por %p1239_p13, %p1238_p12 }
  0x21   :  { %p1241_p1 = pnand %p1240_p0, %p1234_p11 }
  0x23   :  { %1244 = shalt.err (!%p1241_p1)
}
  0x24   :  { %67 = dma.hbm_to_vmem [thread:$0]  %s1510_s5, 4096, %s62_s24, [#allocation9], %s1342_s19, %s1342_s19, %s1343_s20  }
  0x25   :  { %s1245_s17 = scalar_lea.hbm %s1505_s0, 128 }
  0x26   :  { %p1246_p2 = scmp.ne.s32.totalorder %s1505_s0, %s1245_s17  ;;  %p1249_p3 = scmp.lt.u32.totalorder %s1245_s17, %s1505_s0 }
  0x28   :  { %p1251_p4 = pnand %p1249_p3, %p1246_p2 }
  0x2a   :  { %1254 = shalt.err (!%p1251_p4)
}
  0x2b   :  { %s1255_s25 = scalar_lea.vmem %s25_s26, 128  ;;  %p1260_p6 = scmp.lt.s32.totalorder %s25_s26, %s25_s26 }
  0x2c   :  { %p1256_p5 = scmp.ne.s32.totalorder %s25_s26, %s1255_s25  ;;  %p1261_p7 = scmp.lt.s32.totalorder %s1255_s25, %s1255_s25 }
  0x2e   :  { %p1262_p8 = por %p1261_p7, %p1260_p6 }
  0x30   :  { %p1263_p9 = pnand %p1262_p8, %p1256_p5 }
  0x32   :  { %1266 = shalt.err (!%p1263_p9)
}
  0x33   :  { %27 = dma.hbm_to_vmem [thread:$0]  %s1505_s0, 128, %s25_s26, [#allocation3]  }
  0x34   :  { %s1346_s27 = smov [#allocation7]   ;;  %s1347_s29 = smov [#allocation10]  }
  0x35   :  { %s47_s28 = sshll.u32 %s1346_s27, 4  ;;  %s75_s30 = sshll.u32 %s1347_s29, 4  ;;  %s48_s28 = int_to_ptr.vmem [resolvable:$true] %s47_s28  ;;  %s76_s30 = int_to_ptr.vmem [resolvable:$true] %s75_s30 }
  0x36   :  { %s1267_s13 = scalar_lea.hbm %s1508_s3, 4096 }
  0x37   :  { %p1268_p10 = scmp.ne.s32.totalorder %s1508_s3, %s1267_s13  ;;  %p1271_p11 = scmp.lt.u32.totalorder %s1267_s13, %s1508_s3 }
  0x39   :  { %p1273_p12 = pnand %p1271_p11, %p1268_p10 }
  0x3b   :  { %1276 = shalt.err (!%p1273_p12)
}
  0x3c   :  { %s1277_s0 = scalar_lea.vmem %s48_s28, 4096  ;;  %p1282_p0 = scmp.lt.s32.totalorder %s48_s28, %s48_s28 }
  0x3d   :  { %p1278_p13 = scmp.ne.s32.totalorder %s48_s28, %s1277_s0  ;;  %p1283_p1 = scmp.lt.s32.totalorder %s1277_s0, %s1277_s0 }
  0x3f   :  { %p1284_p2 = por %p1283_p1, %p1282_p0 }
  0x41   :  { %p1285_p3 = pnand %p1284_p2, %p1278_p13 }
  0x43   :  { %1288 = shalt.err (!%p1285_p3)
}
  0x44   :  { %53 = dma.hbm_to_vmem [thread:$0]  %s1508_s3, 4096, %s48_s28, [#allocation6], %s1342_s19, %s1342_s19, %s1343_s20  }
  0x45   :  { %s1289_s21 = scalar_lea.hbm %s1512_s7, 2048 }
  0x46   :  { %p1290_p4 = scmp.ne.s32.totalorder %s1512_s7, %s1289_s21  ;;  %p1293_p5 = scmp.lt.u32.totalorder %s1289_s21, %s1512_s7 }
  0x48   :  { %p1295_p6 = pnand %p1293_p5, %p1290_p4 }
  0x4a   :  { %1298 = shalt.err (!%p1295_p6)
}
  0x4b   :  { %s1299_s24 = scalar_lea.vmem %s76_s30, 2048  ;;  %p1304_p8 = scmp.lt.s32.totalorder %s76_s30, %s76_s30 }
  0x4c   :  { %p1300_p7 = scmp.ne.s32.totalorder %s76_s30, %s1299_s24  ;;  %p1305_p9 = scmp.lt.s32.totalorder %s1299_s24, %s1299_s24 }
  0x4e   :  { %p1306_p10 = por %p1305_p9, %p1304_p8 }
  0x50   :  { %p1307_p11 = pnand %p1306_p10, %p1300_p7 }
  0x52   :  { %1310 = shalt.err (!%p1307_p11)
}
  0x53   :  { %s1348_s3 = smov 64   ;;  %s1349_s19 = smov 4  }
  0x54   :  { %81 = dma.hbm_to_vmem [thread:$0]  %s1512_s7, 2048, %s76_s30, [#allocation9], %s1348_s3, %s1348_s3, %s1349_s19  }
  0x55   :  { %1333 = dma.done.wait [#allocation3], 128  }
  0x56   :  { %1334 = vsyncadd [#allocation3], 4294967168 }
  0x57   :  { %1335 = dma.done.wait [#allocation6], 5760  }
  0x58   :  { %1336 = vsyncadd [#allocation6], 4294961536 }
  0x59   :  { %1337 = dma.done.wait [#allocation9], 6144  }
  0x5a   :  { %1338 = vsyncadd [#allocation9], 4294961152  ;;  %v1350_v0 = vmov 0   ;;  %v1069_v1 = vld [vmem:[#allocation5 + $0x4] ss:$8 sps:$4 sm:$0xff]   ;;  %vm196_vm0 = vcmask 1041408  }
  0x5b   :  { %235 = vmatprep.mubr.bf16.mxu0 %v1350_v0  ;;  %v1071_v2 = vld [vmem:[#allocation5] ss:$8 sps:$4 sm:$0xff]   ;;  %203 = vmatprep.subr.bf16.mxu0 %v1069_v1  ;;  %v1072_v3 = vld [vmem:[#allocation5 + $0x14] ss:$8 sps:$4 sm:$0xff]   ;;  %v1074_v4 = vld [vmem:[#allocation5 + $0x10] ss:$8 sps:$4 sm:$0xff]  }
  0x5c   :  { %204 = vmatpush1.bf16.msra.mxu0 %v1071_v2  ;;  %v1075_v5 = vld [vmem:[#allocation5 + $0x24] ss:$8 sps:$4 sm:$0xff]   ;;  %v1077_v6 = vld [vmem:[#allocation5 + $0x20] ss:$8 sps:$4 sm:$0xff]   ;;  %v1078_v7 = vld [vmem:[#allocation5 + $0x34] ss:$8 sps:$4 sm:$0xff]  }
  0x5d   :  { %205 = vmatprep.subr.bf16.mxu0 %v1072_v3  ;;  %v1089_v8 = vld [vmem:[#allocation7 + $0x4] ss:$8 sps:$4 sm:$0xff]   ;;  %v1091_v9 = vld [vmem:[#allocation7] ss:$8 sps:$4 sm:$0xff]   ;;  %v1092_v10 = vld [vmem:[#allocation7 + $0x14] ss:$8 sps:$4 sm:$0xff]  }
  0x5e   :  { %v1080_v11 = vld [vmem:[#allocation5 + $0x30] ss:$8 sps:$4 sm:$0xff]   ;;  %452 = vmatprep.subr.bf16.mxu1 %v1089_v8  ;;  %v1081_v12 = vld [vmem:[#allocation5 + $0x44] ss:$8 sps:$4 sm:$0xff]   ;;  %v1083_v15 = vld [vmem:[#allocation5 + $0x40] ss:$8 sps:$4 sm:$0xff]  }
  0x5f   :  { %453 = vmatpush1.bf16.msra.mxu1 %v1091_v9  ;;  %v1094_v13 = vld [vmem:[#allocation7 + $0x10] ss:$8 sps:$4 sm:$0xff]   ;;  %v1095_v14 = vld [vmem:[#allocation7 + $0x24] ss:$8 sps:$4 sm:$0xff]   ;;  %v1097_v17 = vld [vmem:[#allocation7 + $0x20] ss:$8 sps:$4 sm:$0xff]  }
  0x60   :  { %206 = vmatpush1.bf16.msra.mxu0 %v1074_v4  ;;  %454 = vmatprep.subr.bf16.mxu1 %v1092_v10  ;;  %v1084_v16 = vld [vmem:[#allocation5 + $0x54] ss:$8 sps:$4 sm:$0xff]   ;;  %v114_v18 = vld [vmem:[#allocation5 + $0x60] sm:$0x33]  ;;  %v1086_v20 = vld [vmem:[#allocation5 + $0x50] ss:$8 sps:$4 sm:$0xff]  }
  0x61   :  { %207 = vmatprep.subr.bf16.mxu0 %v1075_v5  ;;  %v1098_v19 = vld [vmem:[#allocation7 + $0x34] ss:$8 sps:$4 sm:$0xff]   ;;  %v952_v21 = vcombine.high %v114_v18, %v114_v18  ;;  %v951_v22 = vcombine.low %v114_v18, %v114_v18  ;;  %v1100_v23 = vld [vmem:[#allocation7 + $0x30] ss:$8 sps:$4 sm:$0xff]   ;;  %v1101_v24 = vld [vmem:[#allocation7 + $0x44] ss:$8 sps:$4 sm:$0xff]  }
  0x62   :  { %v100_v25 = vld [vmem:[#allocation2] sm:$0xff]  ;;  %v1103_v27 = vld [vmem:[#allocation7 + $0x40] ss:$8 sps:$4 sm:$0xff]   ;;  %vm192_vm1 = vcmask 818176   ;;  %v1107_v31 = vld [vmem:[#allocation7 + $0x64] ss:$8 sps:$4 sm:$0xff]  }
  0x63   :  { %455 = vmatpush1.bf16.msra.mxu1 %v1094_v13  ;;  %v198_v26 = vsel %vm196_vm0, %v951_v22, 0  ;;  %v1104_v28 = vld [vmem:[#allocation7 + $0x54] ss:$8 sps:$4 sm:$0xff]   ;;  %v101_v29 = vpack.c.bf16 %v100_v25, %v100_v25  ;;  %v1106_v30 = vld [vmem:[#allocation7 + $0x50] ss:$8 sps:$4 sm:$0xff]  }
  0x64   :  { %208 = vmatpush1.bf16.msra.mxu0 %v1077_v6  ;;  %456 = vmatprep.subr.bf16.mxu1 %v1095_v14  ;;  %v1109_v32 = vld [vmem:[#allocation7 + $0x60] ss:$8 sps:$4 sm:$0xff]   ;;  %v1110_v33 = vld [vmem:[#allocation7 + $0x74] ss:$8 sps:$4 sm:$0xff]   ;;  %v1112_v34 = vld [vmem:[#allocation7 + $0x70] ss:$8 sps:$4 sm:$0xff]  }
  0x65   :  { %209 = vmatprep.subr.bf16.mxu0 %v1078_v7  ;;  %v1113_v35 = vld [vmem:[#allocation7 + $0x84] ss:$8 sps:$4 sm:$0xff]   ;;  %v1115_v36 = vld [vmem:[#allocation7 + $0x80] ss:$8 sps:$4 sm:$0xff]   ;;  %v1116_v37 = vld [vmem:[#allocation7 + $0x94] ss:$8 sps:$4 sm:$0xff]  }
  0x66   :  { %v1118_v38 = vld [vmem:[#allocation7 + $0x90] ss:$8 sps:$4 sm:$0xff]   ;;  %v1119_v39 = vld [vmem:[#allocation7 + $0xa4] ss:$8 sps:$4 sm:$0xff]   ;;  %v1121_v40 = vld [vmem:[#allocation7 + $0xa0] ss:$8 sps:$4 sm:$0xff]  }
  0x67   :  { %457 = vmatpush1.bf16.msra.mxu1 %v1097_v17  ;;  %v1122_v41 = vld [vmem:[#allocation7 + $0xb4] ss:$8 sps:$4 sm:$0xff]   ;;  %v1124_v42 = vld [vmem:[#allocation7 + $0xb0] ss:$8 sps:$4 sm:$0xff]   ;;  %v1125_v43 = vld [vmem:[#allocation7 + $0xc4] ss:$8 sps:$4 sm:$0xff]  }
  0x68   :  { %210 = vmatpush1.bf16.msra.mxu0 %v1080_v11  ;;  %458 = vmatprep.subr.bf16.mxu1 %v1098_v19  ;;  %v1127_v44 = vld [vmem:[#allocation7 + $0xc0] ss:$8 sps:$4 sm:$0xff]   ;;  %v1128_v45 = vld [vmem:[#allocation7 + $0xd4] ss:$8 sps:$4 sm:$0xff]   ;;  %v1130_v46 = vld [vmem:[#allocation7 + $0xd0] ss:$8 sps:$4 sm:$0xff]  }
  0x69   :  { %211 = vmatprep.subr.bf16.mxu0 %v1081_v12  ;;  %v1131_v47 = vld [vmem:[#allocation7 + $0xe4] ss:$8 sps:$4 sm:$0xff]   ;;  %v1133_v48 = vld [vmem:[#allocation7 + $0xe0] ss:$8 sps:$4 sm:$0xff]   ;;  %v1134_v49 = vld [vmem:[#allocation7 + $0xf4] ss:$8 sps:$4 sm:$0xff]  }
  0x6a   :  { %v1136_v50 = vld [vmem:[#allocation7 + $0xf0] ss:$8 sps:$4 sm:$0xff]   ;;  %v1137_v51 = vld [vmem:[#allocation8] ss:$8 sps:$4 sm:$0xff]   ;;  %v1139_v52 = vld [vmem:[#allocation8 + $0x4] ss:$8 sps:$4 sm:$0xff]  }
  0x6b   :  { %459 = vmatpush1.bf16.msra.mxu1 %v1100_v23  ;;  %v1142_v53 = vld [vmem:[#allocation8 + $0x14] ss:$8 sps:$4 sm:$0xff]   ;;  %v1140_v54 = vld [vmem:[#allocation8 + $0x10] ss:$8 sps:$4 sm:$0xff]   ;;  %v1145_v55 = vld [vmem:[#allocation8 + $0x24] ss:$8 sps:$4 sm:$0xff]  }
  0x6c   :  { %212 = vmatpush1.bf16.msra.mxu0 %v1083_v15  ;;  %460 = vmatprep.subr.bf16.mxu1 %v1101_v24  ;;  %v1143_v56 = vld [vmem:[#allocation8 + $0x20] ss:$8 sps:$4 sm:$0xff]   ;;  %v1148_v57 = vld [vmem:[#allocation8 + $0x34] ss:$8 sps:$4 sm:$0xff]   ;;  %v1146_v58 = vld [vmem:[#allocation8 + $0x30] ss:$8 sps:$4 sm:$0xff]   ;;  %v117_v15 = vlaneseq }
  0x6d   :  { %213 = vmatprep.subr.bf16.mxu0 %v1084_v16  ;;  %v1151_v59 = vld [vmem:[#allocation8 + $0x44] ss:$8 sps:$4 sm:$0xff]   ;;  %v1149_v60 = vld [vmem:[#allocation8 + $0x40] ss:$8 sps:$4 sm:$0xff]   ;;  %v1154_v61 = vld [vmem:[#allocation8 + $0x54] ss:$8 sps:$4 sm:$0xff]  }
  0x6e   :  { %v1152_v62 = vld [vmem:[#allocation8 + $0x50] ss:$8 sps:$4 sm:$0xff]   ;;  %v1157_v63 = vld [vmem:[#allocation8 + $0x64] ss:$8 sps:$4 sm:$0xff]   ;;  %v1155_v0 = vld [vmem:[#allocation8 + $0x60] ss:$8 sps:$4 sm:$0xff]  }
  0x6f   :  { %461 = vmatpush1.bf16.msra.mxu1 %v1103_v27  ;;  %v1160_v1 = vld [vmem:[#allocation8 + $0x74] ss:$8 sps:$4 sm:$0xff]   ;;  %v1158_v2 = vld [vmem:[#allocation8 + $0x70] ss:$8 sps:$4 sm:$0xff]   ;;  %v1163_v3 = vld [vmem:[#allocation8 + $0x84] ss:$8 sps:$4 sm:$0xff]  }
  0x70   :  { %214 = vmatpush1.bf16.msra.mxu0 %v1086_v20  ;;  %462 = vmatprep.subr.bf16.mxu1 %v1104_v28  ;;  %v1161_v4 = vld [vmem:[#allocation8 + $0x80] ss:$8 sps:$4 sm:$0xff]   ;;  %v1166_v5 = vld [vmem:[#allocation8 + $0x94] ss:$8 sps:$4 sm:$0xff]   ;;  %v1164_v6 = vld [vmem:[#allocation8 + $0x90] ss:$8 sps:$4 sm:$0xff]  }
  0x71   :  { %953 = vmatprep.subr.msk.bf16.mxu0 %vm196_vm0, %v952_v21  ;;  %v1169_v7 = vld [vmem:[#allocation8 + $0xa4] ss:$8 sps:$4 sm:$0xff]   ;;  %v1167_v8 = vld [vmem:[#allocation8 + $0xa0] ss:$8 sps:$4 sm:$0xff]   ;;  %v1172_v9 = vld [vmem:[#allocation8 + $0xb4] ss:$8 sps:$4 sm:$0xff]  }
  0x72   :  { %v1170_v10 = vld [vmem:[#allocation8 + $0xb0] ss:$8 sps:$4 sm:$0xff]   ;;  %v1175_v11 = vld [vmem:[#allocation8 + $0xc4] ss:$8 sps:$4 sm:$0xff]   ;;  %v1173_v12 = vld [vmem:[#allocation8 + $0xc0] ss:$8 sps:$4 sm:$0xff]  }
  0x73   :  { %463 = vmatpush1.bf16.msra.mxu1 %v1106_v30  ;;  %v1178_v13 = vld [vmem:[#allocation8 + $0xd4] ss:$8 sps:$4 sm:$0xff]   ;;  %v1176_v14 = vld [vmem:[#allocation8 + $0xd0] ss:$8 sps:$4 sm:$0xff]   ;;  %v118_v16 = vshrl.u32 %v117_v15, 7 }
  0x74   :  { %216 = vmatpush1.bf16.msra.mxu0 %v198_v26  ;;  %464 = vmatprep.subr.bf16.mxu1 %v1107_v31  ;;  %v115_v18 = vld [vmem:[%s1507_s2] sm:$0x3] }
  0x75   :  { %701 = vmatprep.subr.bf16.mxu0 %v1139_v52  ;;  %v1471_v17 = vsub.s32 0, %v118_v16  ;;  %v1476_v19 = vsub.s32 1, %v118_v16  ;;  %v1019_v15 = vld [vmem:[%s1513_s8] ss:$0 sm:$0xff] }
  0x77   :  { %954 = vmatmul.mubr.msk.bf16.vlgmr.msra.gmra.mrb[0].mxu0 %vm192_vm1, %v101_v29  ;;  %465 = vmatpush1.bf16.msra.mxu1 %v1109_v32  ;;  %v120_v20 = vrot.slane %v115_v18, %v1471_v17  ;;  %v124_v21 = vrot.slane %v115_v18, %v1476_v19  ;;  %v1181_v32 = vld [vmem:[#allocation8 + $0xe4] ss:$8 sps:$4 sm:$0xff]  }
  0x78   :  { %466 = vmatprep.subr.bf16.mxu1 %v1110_v33  ;;  %702 = vmatpush1.bf16.msra.mxu0 %v1137_v51  ;;  %v1179_v33 = vld [vmem:[#allocation8 + $0xe0] ss:$8 sps:$4 sm:$0xff]  }
  0x79   :  { %703 = vmatprep.subr.bf16.mxu0 %v1142_v53 }
  0x7b   :  { %467 = vmatpush1.bf16.msra.mxu1 %v1112_v34  ;;  %v1184_v34 = vld [vmem:[#allocation8 + $0xf4] ss:$8 sps:$4 sm:$0xff]  }
  0x7c   :  { %468 = vmatprep.subr.bf16.mxu1 %v1113_v35  ;;  %704 = vmatpush1.bf16.msra.mxu0 %v1140_v54  ;;  %v1182_v35 = vld [vmem:[#allocation8 + $0xf0] ss:$8 sps:$4 sm:$0xff]  }
  0x7d   :  { %705 = vmatprep.subr.bf16.mxu0 %v1145_v55 }
  0x7f   :  { %469 = vmatpush1.bf16.msra.mxu1 %v1115_v36  ;;  %v1185_v36 = vld [vmem:[#allocation10 + $0x40] sm:$0xff]  }
  0x80   :  { %470 = vmatprep.subr.bf16.mxu1 %v1116_v37  ;;  %706 = vmatpush1.bf16.msra.mxu0 %v1143_v56  ;;  %v1186_v37 = vld [vmem:[#allocation10] sm:$0xff]  }
  0x81   :  { %707 = vmatprep.subr.bf16.mxu0 %v1148_v57 }
  0x83   :  { %471 = vmatpush1.bf16.msra.mxu1 %v1118_v38  ;;  %v1187_v38 = vld [vmem:[#allocation10 + $0x48] sm:$0xff]  }
  0x84   :  { %472 = vmatprep.subr.bf16.mxu1 %v1119_v39  ;;  %708 = vmatpush1.bf16.msra.mxu0 %v1146_v58  ;;  %v1188_v39 = vld [vmem:[#allocation10 + $0x8] sm:$0xff]  }
  0x85   :  { %709 = vmatprep.subr.bf16.mxu0 %v1151_v59 }
  0x87   :  { %473 = vmatpush1.bf16.msra.mxu1 %v1121_v40  ;;  %v1189_v40 = vld [vmem:[#allocation10 + $0x50] sm:$0xff]  }
  0x88   :  { %474 = vmatprep.subr.bf16.mxu1 %v1122_v41  ;;  %710 = vmatpush1.bf16.msra.mxu0 %v1149_v60  ;;  %v1190_v41 = vld [vmem:[#allocation10 + $0x10] sm:$0xff]  }
  0x89   :  { %711 = vmatprep.subr.bf16.mxu0 %v1154_v61  ;;  %v1197_v61 = vld [vmem:[#allocation10 + $0x70] sm:$0xff]  }
  0x8b   :  { %475 = vmatpush1.bf16.msra.mxu1 %v1124_v42  ;;  %v1191_v42 = vld [vmem:[#allocation10 + $0x58] sm:$0xff]  }
  0x8c   :  { %476 = vmatprep.subr.bf16.mxu1 %v1125_v43  ;;  %712 = vmatpush1.bf16.msra.mxu0 %v1152_v62  ;;  %v1192_v43 = vld [vmem:[#allocation10 + $0x18] sm:$0xff]   ;;  %v1198_v62 = vld [vmem:[#allocation10 + $0x30] sm:$0xff]  }
  0x8d   :  { %713 = vmatprep.subr.bf16.mxu0 %v1157_v63  ;;  %v1199_v63 = vld [vmem:[#allocation10 + $0x78] sm:$0xff]  }
  0x8f   :  { %477 = vmatpush1.bf16.msra.mxu1 %v1127_v44  ;;  %v1193_v44 = vld [vmem:[#allocation10 + $0x60] sm:$0xff]  }
  0x90   :  { %478 = vmatprep.subr.bf16.mxu1 %v1128_v45  ;;  %714 = vmatpush1.bf16.msra.mxu0 %v1155_v0  ;;  %v1194_v45 = vld [vmem:[#allocation10 + $0x20] sm:$0xff]   ;;  %v1200_v0 = vld [vmem:[#allocation10 + $0x38] sm:$0xff]  }
  0x91   :  { %715 = vmatprep.subr.bf16.mxu0 %v1160_v1  ;;  %v529_v1 = vld [vmem:[%s1511_s6] sm:$0x3]  ;;  %s1351_s6 = smov [#allocation11]  }
  0x92   :  { %s928_s13 = sshll.u32 %s1351_s6, 4  ;;  %s929_s13 = int_to_ptr.vmem [resolvable:$true] %s928_s13 }
  0x93   :  { %479 = vmatpush1.bf16.msra.mxu1 %v1130_v46  ;;  %v1195_v46 = vld [vmem:[#allocation10 + $0x68] sm:$0xff]   ;;  %s1311_s1 = scalar_lea.vmem %s929_s13, 128  ;;  %p1316_p13 = scmp.lt.s32.totalorder %s929_s13, %s929_s13 }
  0x94   :  { %480 = vmatprep.subr.bf16.mxu1 %v1131_v47  ;;  %716 = vmatpush1.bf16.msra.mxu0 %v1158_v2  ;;  %v1196_v47 = vld [vmem:[#allocation10 + $0x28] sm:$0xff]   ;;  %v534_v2 = vrot.slane %v529_v1, %v1471_v17  ;;  %p1312_p12 = scmp.ne.s32.totalorder %s929_s13, %s1311_s1  ;;  %p1317_p0 = scmp.lt.s32.totalorder %s1311_s1, %s1311_s1 }
  0x95   :  { %717 = vmatprep.subr.bf16.mxu0 %v1163_v3  ;;  %v538_v3 = vrot.slane %v529_v1, %v1476_v19 }
  0x96   :  { %p1318_p1 = por %p1317_p0, %p1316_p13 }
  0x97   :  { %481 = vmatpush1.bf16.msra.mxu1 %v1133_v48  ;;  %v280_v48 = vld [vmem:[%s1509_s4] sm:$0x3] }
  0x98   :  { %482 = vmatprep.subr.bf16.mxu1 %v1134_v49  ;;  %718 = vmatpush1.bf16.msra.mxu0 %v1161_v4  ;;  %v285_v49 = vrot.slane %v280_v48, %v1471_v17  ;;  %p1319_p2 = pnand %p1318_p1, %p1312_p12 }
  0x99   :  { %719 = vmatprep.subr.bf16.mxu0 %v1166_v5 }
  0x9b   :  { %483 = vmatpush1.bf16.msra.mxu1 %v1136_v50  ;;  %v289_v50 = vrot.slane %v280_v48, %v1476_v19 }
  0x9c   :  { %720 = vmatpush1.bf16.msra.mxu0 %v1164_v6  ;;  %1036 = vmatprep.subr.bf16.mxu1 %v1185_v36 }
  0x9d   :  { %721 = vmatprep.subr.bf16.mxu0 %v1169_v7 }
  0xa0   :  { %722 = vmatpush1.bf16.msra.mxu0 %v1167_v8 }
  0xa1   :  { %723 = vmatprep.subr.bf16.mxu0 %v1172_v9 }
  0xa4   :  { %724 = vmatpush1.bf16.msra.mxu0 %v1170_v10 }
  0xa5   :  { %725 = vmatprep.subr.bf16.mxu0 %v1175_v11 }
  0xa8   :  { %726 = vmatpush1.bf16.msra.mxu0 %v1173_v12 }
  0xa9   :  { %727 = vmatprep.subr.bf16.mxu0 %v1178_v13 }
  0xac   :  { %728 = vmatpush1.bf16.msra.mxu0 %v1176_v14 }
  0xad   :  { %729 = vmatprep.subr.bf16.mxu0 %v1181_v32 }
  0xb0   :  { %730 = vmatpush1.bf16.msra.mxu0 %v1179_v33 }
  0xb1   :  { %731 = vmatprep.subr.bf16.mxu0 %v1184_v34 }
  0xb4   :  { %732 = vmatpush1.bf16.msra.mxu0 %v1182_v35 }
 0x14a   :  { %v237_v22 = vpop.f32.mrb[0].mxu0 }
 0x14b   :  { %v238_v23 = vadd.f32 %v237_v22, %v120_v20  ;;  %v239_v24 = vpop.f32.mrb[1].mxu0 }
 0x14c   :  { %v240_v25 = vadd.f32 %v239_v24, %v124_v21  ;;  %v241_v26 = vpop.f32.mrb[2].mxu0 }
 0x14d   :  { %v244_v27 = vmax.f32 %v238_v23, 0.0  ;;  %v242_v28 = vpop.f32.mrb[3].mxu0 }
 0x14e   :  { %v245_v29 = vmax.f32 %v240_v25, 0.0 }
 0x14f   :  { %v246_v31 = vpack.c.bf16 %v244_v27, %v244_v27 }
 0x150   :  { %v247_v30 = vpack.c.bf16 %v245_v29, %v245_v29 }
 0x152   :  { %484 = vmatprep.mubr.bf16.mxu1 %v247_v30 }
 0x153   :  { %485 = vmatmul.mubr.bf16.vlgmr.msra.gmra.mrb[0].mxu1 %v246_v31 }
 0x154   :  { %1037 = vmatpush3.bf16.msra.mxu1 %v1186_v37 }
 0x155   :  { %1038 = vmatprep.subr.bf16.mxu1 %v1187_v38 }
 0x158   :  { %1039 = vmatpush3.bf16.msra.mxu1 %v1188_v39 }
 0x159   :  { %1040 = vmatprep.subr.bf16.mxu1 %v1189_v40 }
 0x15c   :  { %1041 = vmatpush3.bf16.msra.mxu1 %v1190_v41 }
 0x15d   :  { %1042 = vmatprep.subr.bf16.mxu1 %v1191_v42 }
 0x160   :  { %1043 = vmatpush3.bf16.msra.mxu1 %v1192_v43 }
 0x161   :  { %1044 = vmatprep.subr.bf16.mxu1 %v1193_v44 }
 0x164   :  { %1045 = vmatpush3.bf16.msra.mxu1 %v1194_v45 }
 0x165   :  { %1046 = vmatprep.subr.bf16.mxu1 %v1195_v46 }
 0x168   :  { %1047 = vmatpush3.bf16.msra.mxu1 %v1196_v47 }
 0x169   :  { %1048 = vmatprep.subr.bf16.mxu1 %v1197_v61 }
 0x16c   :  { %1049 = vmatpush3.bf16.msra.mxu1 %v1198_v62 }
 0x16d   :  { %1050 = vmatprep.subr.bf16.mxu1 %v1199_v63 }
 0x170   :  { %1051 = vmatpush3.bf16.msra.mxu1 %v1200_v0 }
 0x226   :  { %v486_v51 = vpop.f32.mrb[0].mxu1 }
 0x227   :  { %v487_v52 = vadd.f32 %v486_v51, %v285_v49  ;;  %v488_v53 = vpop.f32.mrb[1].mxu1 }
 0x228   :  { %v489_v54 = vadd.f32 %v488_v53, %v289_v50  ;;  %v490_v55 = vpop.f32.mrb[2].mxu1 }
 0x229   :  { %v493_v56 = vmax.f32 %v487_v52, 0.0  ;;  %v491_v57 = vpop.f32.mrb[3].mxu1 }
 0x22a   :  { %v494_v58 = vmax.f32 %v489_v54, 0.0 }
 0x22b   :  { %v495_v60 = vpack.c.bf16 %v493_v56, %v493_v56 }
 0x22c   :  { %v496_v59 = vpack.c.bf16 %v494_v58, %v494_v58 }
 0x22e   :  { %733 = vmatprep.mubr.bf16.mxu0 %v496_v59 }
 0x22f   :  { %734 = vmatmul.mubr.bf16.vlgmr.msra.gmra.mrb[4].mxu0 %v495_v60 }
 0x302   :  { %v735_v4 = vpop.f32.mrb[4].mxu0 }
 0x303   :  { %v736_v5 = vadd.f32 %v735_v4, %v534_v2  ;;  %v737_v6 = vpop.f32.mrb[5].mxu0 }
 0x304   :  { %v738_v7 = vadd.f32 %v737_v6, %v538_v3  ;;  %v739_v8 = vpop.f32.mrb[6].mxu0 }
 0x305   :  { %v742_v9 = vmax.f32 %v736_v5, 0.0  ;;  %v740_v10 = vpop.f32.mrb[7].mxu0 }
 0x306   :  { %v743_v11 = vmax.f32 %v738_v7, 0.0 }
 0x307   :  { %v744_v13 = vpack.c.bf16 %v742_v9, %v742_v9 }
 0x308   :  { %v745_v12 = vpack.c.bf16 %v743_v11, %v743_v11 }
 0x30a   :  { %913 = vmatprep.mubr.bf16.mxu1 %v745_v12 }
 0x30b   :  { %914 = vmatmul.mubr.bf16.vlgmr.msra.gmra.mrb[4].mxu1 %v744_v13 }
 0x3de   :  { %v1052_v14 = vpop.f32.mrb[4].mxu1 }
 0x3df   :  { %v1053_v16 = vpop.f32.mrb[5].mxu1 }
 0x3e0   :  { %v1054_v17 = vadd.f32 %v1053_v16, %v1052_v14  ;;  %v1055_v18 = vpop.f32.mrb[6].mxu1 }
 0x3e1   :  { %v1056_v19 = vpop.f32.mrb[7].mxu1 }
 0x3e2   :  { %v916_v20 = vadd.f32 %v1054_v17, %v1019_v15 }
 0x3e4   :  { %921 = vst [vmem:[#allocation11] sm:$0xff] %v916_v20 }
 0x3e5   :  { %1322 = shalt.err (!%p1319_p2)
}
 0x3e6   :  { %s1323_s8 = scalar_lea.hbm %s1514_s9, 128 }
 0x3e7   :  { %p1324_p3 = scmp.ne.s32.totalorder %s1514_s9, %s1323_s8  ;;  %p1327_p4 = scmp.lt.u32.totalorder %s1323_s8, %s1514_s9 }
 0x3e9   :  { %p1329_p5 = pnand %p1327_p4, %p1324_p3 }
 0x3eb   :  { %1332 = shalt.err (!%p1329_p5)
}
 0x3ec   :  { %931 = dma.vmem_to_hbm [thread:$0]  %s929_s13, 128, %s1514_s9, [#allocation4]  }
 0x3ed   :  { %1339 = dma.done.wait [#allocation4], 128  }
 0x3ee   :  { %1340 = vsyncadd [#allocation4], 4294967168 }
 0x3ef   :  { %935 = vsyncpa [#allocation3], 1 }
 0x3f0   :  { %936 = vsyncpa [#allocation6], 1 }
 0x3f1   :  { %937 = vsyncpa [#allocation9], 1 }
 0x3f2   :  { %938 = vsyncpa [#allocation4], 1 }

</bundles_post_ra>
